<compile_context>
chip_gen: v7x
topology: tpu7x:2x2x1
jax: 0.10.0
libtpu: 0.0.40
codegen_flags: <defaults>
</compile_context>

<pallas_src>
import math

import jax
import jax.numpy as jnp
from jax import lax
from jax.experimental import pallas as pl
from jax.experimental.pallas import tpu as pltpu

LN_EPS = 1e-5
NEG_INF = -1e9                 # additive-mask "-inf" (same value used by caller)
APPROX_SOFTMAX_RECIP = True    # EUP reciprocal for softmax denom (~1e-3 rel err)


# ---------------------------------------------------------------------------
# Small helpers
# ---------------------------------------------------------------------------
def _round_up(x, m):
    return (x + m - 1) // m * m


def _pick_tile(n, target):
    """Largest multiple of 8 <= target that divides n (else n itself = full dim)."""
    if n <= target:
        return n
    t = (target // 8) * 8
    while t >= 8:
        if n % t == 0:
            return t
        t -= 8
    return n


def _vmem_limit_bytes():
    """Generation-dependent VMEM budget (v7x: 64 MiB/TC, v5e/v6e: 128 MiB)."""
    try:
        cap = int(pltpu.get_tpu_info().vmem_capacity_bytes)
    except Exception:
        return 48 * 1024 * 1024                                  # safe everywhere
    if cap >= 128 * 1024 * 1024:                                 # v5e / v6e
        return 100 * 1024 * 1024
    return max(cap - 24 * 1024 * 1024, 32 * 1024 * 1024)         # v7x -> ~40 MiB


VMEM_LIMIT = _vmem_limit_bytes()
_BIG_VMEM = VMEM_LIMIT >= 64 * 1024 * 1024
TQ_TARGET = 256 if _BIG_VMEM else 128        # query-tile rows per grid step
DEC_TM_TARGET = 512 if _BIG_VMEM else 256    # decoder row tile
DEC_TV_TARGET = 1024                         # decoder vocab tile (lane-dense)


def _compiler_params(n_axes):
    return pltpu.CompilerParams(
        dimension_semantics=("parallel",) * n_axes,
        vmem_limit_bytes=VMEM_LIMIT)


def _const_spec(shape):
    """Grid-constant operand (weights/biases/LN params): single-buffered."""
    zeros = tuple(0 for _ in shape)
    idx = lambda *_: zeros
    try:
        return pl.BlockSpec(shape, idx, pipeline_mode=pl.Buffered(1))
    except (TypeError, AttributeError):
        return pl.BlockSpec(shape, idx)      # fallback: default double-buffering


# ---------------------------------------------------------------------------
# Kernel 1: fused QKV projection,  qkv = x @ Wqkv + bqkv   (bf16 output)
# 1/sqrt(head_dim) is already folded into the Q columns of Wqkv / bqkv.
# ---------------------------------------------------------------------------
def _qkv_kernel(x_ref, w_ref, b_ref, o_ref):
    x_bf = x_ref[0].astype(jnp.bfloat16)                                # [TR, D]
    acc = jnp.dot(x_bf, w_ref[...],
                  preferred_element_type=jnp.float32) + b_ref[...]      # [TR, 3D]
    o_ref[0] = acc.astype(o_ref.dtype)


def _qkv_projection(x_bsd, wqkv_bf, bqkv):
    B, S, D = x_bsd.shape
    TR = _pick_tile(S, 256)
    return pl.pallas_call(
        _qkv_kernel,
        out_shape=jax.ShapeDtypeStruct((B, S, 3 * D), jnp.bfloat16),
        grid=(B, S // TR),
        in_specs=[pl.BlockSpec((1, TR, D), lambda b, r: (b, r, 0)),
                  _const_spec((D, 3 * D)),
                  _const_spec((1, 3 * D))],
        out_specs=pl.BlockSpec((1, TR, 3 * D), lambda b, r: (b, r, 0)),
        compiler_params=_compiler_params(2),
    )(x_bsd, wqkv_bf, bqkv)


# ---------------------------------------------------------------------------
# Kernel 2: query-tiled  attention + residual/LN1 + FFN + residual/LN2
# ---------------------------------------------------------------------------
def _attn_ffn_body(q_ref, k_ref, v_ref, x_ref, mask_ref,
                   wo_ref, bo_ref, g1_ref, be1_ref,
                   w1_ref, bb1_ref, w2_ref, bb2_ref, g2_ref, be2_ref,
                   o_ref, *, nhead, causal, tq):
    q = q_ref[0]                    # [nhead, TQ, hd] bf16   (scale pre-folded)
    k = k_ref[0]                    # [nhead, S,  hd] bf16
    v = v_ref[0]                    # [nhead, S,  hd] bf16
    S = k.shape[1]

    # --- scores (batched over heads, single contraction -> MXU friendly) ----
    scores = jnp.einsum('hqd,hkd->hqk', q, k,
                        preferred_element_type=jnp.float32)   # [nhead, TQ, S]

    if causal:
        # generate the causal additive mask in-kernel (no [S,S] HBM/VMEM cost)
        qi = pl.program_id(1)
        row = qi * tq + lax.broadcasted_iota(jnp.int32, (tq, S), 0)
        col = lax.broadcasted_iota(jnp.int32, (tq, S), 1)
        add = jnp.where(col <= row, 0.0, NEG_INF).astype(jnp.float32)
    else:
        add = mask_ref[...]                                   # [TQ, S] additive
    scores = scores + add[None, :, :]

    # --- softmax (f32) -------------------------------------------------------
    m = jnp.max(scores, axis=-1, keepdims=True)
    p = jnp.exp(scores - m)
    l = jnp.sum(p, axis=-1, keepdims=True)
    if APPROX_SOFTMAX_RECIP:
        p = p * pl.reciprocal(l, approx=True)     # EUP slot; ~1e-3 rel err
    else:
        p = p / l

    # --- context + single full-K output projection ---------------------------
    ctx = jnp.einsum('hqk,hkd->hqd', p.astype(jnp.bfloat16), v,
                     preferred_element_type=jnp.float32)      # [nhead, TQ, hd]
    ctx_cat = jnp.concatenate([ctx[h] for h in range(nhead)], axis=-1)  # [TQ, D]
    proj = jnp.dot(ctx_cat.astype(jnp.bfloat16), wo_ref[...],
                   preferred_element_type=jnp.float32) + bo_ref[...]

    # --- residual + LayerNorm1 (f32) -----------------------------------------
    y = x_ref[0] + proj
    mu = jnp.mean(y, axis=-1, keepdims=True)
    var = jnp.mean((y - mu) ** 2, axis=-1, keepdims=True)
    y = (y - mu) * lax.rsqrt(var + LN_EPS) * g1_ref[...] + be1_ref[...]

    # --- feed-forward on the [TQ, H] slice ------------------------------------
    h1 = jnp.maximum(
        jnp.dot(y.astype(jnp.bfloat16), w1_ref[...],
                preferred_element_type=jnp.float32) + bb1_ref[...], 0.0)
    ff = jnp.dot(h1.astype(jnp.bfloat16), w2_ref[...],
                 preferred_element_type=jnp.float32) + bb2_ref[...]

    # --- residual + LayerNorm2 (f32) -----------------------------------------
    z = y + ff
    mu2 = jnp.mean(z, axis=-1, keepdims=True)
    var2 = jnp.mean((z - mu2) ** 2, axis=-1, keepdims=True)
    z = (z - mu2) * lax.rsqrt(var2 + LN_EPS) * g2_ref[...] + be2_ref[...]

    o_ref[0] = z.astype(o_ref.dtype)


def _make_attn_kernel(nhead, causal, tq):
    def kernel(*args):
        if causal:
            q_ref, k_ref, v_ref, x_ref = args[:4]
            mask_ref, rest = None, args[4:]
        else:
            q_ref, k_ref, v_ref, x_ref, mask_ref = args[:5]
            rest = args[5:]
        _attn_ffn_body(q_ref, k_ref, v_ref, x_ref, mask_ref, *rest,
                       nhead=nhead, causal=causal, tq=tq)
    return kernel


def encoder_layer(x_bsd, mask, layer, nhead, causal=False):
    """One post-norm TransformerEncoderLayer.  x_bsd: [B, S, D] f32."""
    B, S, D = x_bsd.shape
    H = layer["w1"].shape[1]
    hd = D // nhead
    bf = jnp.bfloat16

    # ---- 1) fused QKV projection (Pallas) -----------------------------------
    qkv = _qkv_projection(x_bsd, layer["wqkv"].astype(bf), layer["bqkv"])

    # head split [B,S,3D] -> [3, B, nhead, S, hd]  (plain-JAX layout glue so the
    # attention kernel never slices sub-128-lane head columns)
    qkv = jnp.transpose(qkv.reshape(B, S, 3, nhead, hd), (2, 0, 3, 1, 4))
    qh, kh, vh = qkv[0], qkv[1], qkv[2]

    # ---- 2) attention + LN1 + FFN + LN2, tiled over query blocks ------------
    TQ = _pick_tile(S, TQ_TARGET)
    kernel = _make_attn_kernel(nhead, causal, TQ)

    in_specs = [
        pl.BlockSpec((1, nhead, TQ, hd), lambda b, qi: (b, 0, qi, 0)),   # q tile
        pl.BlockSpec((1, nhead, S, hd), lambda b, qi: (b, 0, 0, 0)),     # k (full)
        pl.BlockSpec((1, nhead, S, hd), lambda b, qi: (b, 0, 0, 0)),     # v (full)
        pl.BlockSpec((1, TQ, D), lambda b, qi: (b, qi, 0)),              # residual
    ]
    inputs = [qh, kh, vh, x_bsd]
    if not causal:
        in_specs.append(pl.BlockSpec((TQ, S), lambda b, qi: (qi, 0)))    # mask tile
        inputs.append(mask)
    in_specs += [
        _const_spec((D, D)), _const_spec((1, D)),      # W_O, b_O
        _const_spec((1, D)), _const_spec((1, D)),      # LN1 gamma / beta
        _const_spec((D, H)), _const_spec((1, H)),      # linear1
        _const_spec((H, D)), _const_spec((1, D)),      # linear2
        _const_spec((1, D)), _const_spec((1, D)),      # LN2 gamma / beta
    ]
    inputs += [
        layer["wo"].astype(bf), layer["bo"],
        layer["g1"], layer["be1"],
        layer["w1"].astype(bf), layer["bb1"],
        layer["w2"].astype(bf), layer["bb2"],
        layer["g2"], layer["be2"],
    ]

    # TODO(synk): optionally carry inter-layer activations in bf16 (halves the
    # per-layer HBM round trip, biggest win on v5e) once validated vs f32 ref.
    return pl.pallas_call(
        kernel,
        out_shape=jax.ShapeDtypeStruct((B, S, D), jnp.float32),
        grid=(B, S // TQ),
        in_specs=in_specs,
        out_specs=pl.BlockSpec((1, TQ, D), lambda b, qi: (b, qi, 0)),
        compiler_params=_compiler_params(2),
    )(*inputs)


# ---------------------------------------------------------------------------
# Kernel 3: decoder Linear(d_model -> ntokens), row-flattened & vocab-tiled
# ---------------------------------------------------------------------------
def _decoder_kernel(x_ref, w_ref, b_ref, o_ref):
    acc = jnp.dot(x_ref[...], w_ref[...], preferred_element_type=jnp.float32)
    o_ref[...] = (acc + b_ref[...]).astype(o_ref.dtype)


def decoder(x_bsd, w_dv, b_v):
    B, S, D = x_bsd.shape
    V = w_dv.shape[1]
    BS = B * S

    TM = min(DEC_TM_TARGET, _round_up(BS, 8))
    BSp = _round_up(BS, TM)
    TV = min(DEC_TV_TARGET, _round_up(V, 128))
    Vp = _round_up(V, TV)

    # bf16 activations / weights (mem-bound kernel): halves HBM traffic
    x2d = x_bsd.reshape(BS, D).astype(jnp.bfloat16)
    if BSp != BS:
        x2d = jnp.pad(x2d, ((0, BSp - BS), (0, 0)))
    w_bf = w_dv.astype(jnp.bfloat16)
    b_p = b_v
    if Vp != V:
        w_bf = jnp.pad(w_bf, ((0, 0), (0, Vp - V)))
        b_p = jnp.pad(b_v, ((0, 0), (0, Vp - V)))

    n_r, n_v = BSp // TM, Vp // TV
    # Put the row axis innermost when the LM-head weight is the larger operand:
    # each [D, TV] weight block is then fetched from HBM exactly once.
    rows_inner = Vp >= BSp
    if rows_inner:
        grid = (n_v, n_r)
        x_spec = pl.BlockSpec((TM, D), lambda jv, ir: (ir, 0))
        w_spec = pl.BlockSpec((D, TV), lambda jv, ir: (0, jv))
        b_spec = pl.BlockSpec((1, TV), lambda jv, ir: (0, jv))
        o_spec = pl.BlockSpec((TM, TV), lambda jv, ir: (ir, jv))
    else:
        grid = (n_r, n_v)
        x_spec = pl.BlockSpec((TM, D), lambda ir, jv: (ir, 0))
        w_spec = pl.BlockSpec((D, TV), lambda ir, jv: (0, jv))
        b_spec = pl.BlockSpec((1, TV), lambda ir, jv: (0, jv))
        o_spec = pl.BlockSpec((TM, TV), lambda ir, jv: (ir, jv))

    out = pl.pallas_call(
        _decoder_kernel,
        out_shape=jax.ShapeDtypeStruct((BSp, Vp), jnp.float32),
        grid=grid,
        in_specs=[x_spec, w_spec, b_spec],
        out_specs=o_spec,
        compiler_params=_compiler_params(2),
    )(x2d, w_bf, b_p)
    return out[:BS, :V].reshape(B, S, V)


# ---------------------------------------------------------------------------
# Parameter construction (mirrors the PyTorch __init__ shapes; sqrt(d_model)
# and 1/sqrt(head_dim) scalings are folded into the parameters -- free).
# ---------------------------------------------------------------------------
def make_positional_encoding(d_model, max_len):
    position = jnp.arange(max_len, dtype=jnp.float32)[:, None]
    div_term = jnp.exp(jnp.arange(0, d_model, 2, dtype=jnp.float32)
                       * (-math.log(10000.0) / d_model))
    pe = jnp.zeros((max_len, d_model), dtype=jnp.float32)
    pe = pe.at[:, 0::2].set(jnp.sin(position * div_term))
    pe = pe.at[:, 1::2].set(jnp.cos(position * div_term))
    return pe                                                   # [L, D]


def make_params(key, ntokens, d_model, nhead, d_hid, nlayers, max_len=5000):
    initrange = 0.1
    hd = d_model // nhead
    q_scale = 1.0 / math.sqrt(hd)
    keys = jax.random.split(key, 2 + nlayers)
    params = {
        "nhead": nhead,
        # sqrt(d_model) scaling of the embedding output folded into the table
        "emb": jax.random.uniform(keys[0], (ntokens, d_model), jnp.float32,
                                  -initrange, initrange) * math.sqrt(d_model),
        "pe": make_positional_encoding(d_model, max_len),
        "dec_w": jax.random.uniform(keys[1], (d_model, ntokens), jnp.float32,
                                    -initrange, initrange),
        "dec_b": jnp.zeros((1, ntokens), jnp.float32),
        "layers": [],
    }
    for li in range(nlayers):
        lk = jax.random.split(keys[2 + li], 6)
        s_attn = 1.0 / math.sqrt(d_model)
        s_ffn = 1.0 / math.sqrt(d_hid)
        wqkv = jax.random.uniform(lk[0], (d_model, 3 * d_model), jnp.float32,
                                  -s_attn, s_attn)
        bqkv = jnp.zeros((1, 3 * d_model), jnp.float32)
        # fold 1/sqrt(head_dim) into the Q columns of the QKV projection
        wqkv = wqkv.at[:, :d_model].multiply(q_scale)
        bqkv = bqkv.at[:, :d_model].multiply(q_scale)
        layer = {
            "wqkv": wqkv, "bqkv": bqkv,                   # x @ Wqkv convention
            "wo": jax.random.uniform(lk[1], (d_model, d_model), jnp.float32,
                                     -s_attn, s_attn),
            "bo": jnp.zeros((1, d_model), jnp.float32),
            "g1": jnp.ones((1, d_model), jnp.float32),
            "be1": jnp.zeros((1, d_model), jnp.float32),
            "w1": jax.random.uniform(lk[2], (d_model, d_hid), jnp.float32,
                                     -s_attn, s_attn),
            "bb1": jax.random.uniform(lk[3], (1, d_hid), jnp.float32,
                                      -s_attn, s_attn),
            "w2": jax.random.uniform(lk[4], (d_hid, d_model), jnp.float32,
                                     -s_ffn, s_ffn),
            "bb2": jax.random.uniform(lk[5], (1, d_model), jnp.float32,
                                      -s_ffn, s_ffn),
            "g2": jnp.ones((1, d_model), jnp.float32),
            "be2": jnp.zeros((1, d_model), jnp.float32),
        }
        params["layers"].append(layer)
    return params


# ---------------------------------------------------------------------------
# Full forward pass
# ---------------------------------------------------------------------------
def transformer_forward(params, src, src_mask=None, causal=False):
    """src: [S, B] int32; src_mask: [S, S] additive float mask (or None when
    causal=True, in which case the causal mask is generated inside the kernel).
    Returns [S, B, ntokens] float32 (same axis convention as the PyTorch model)."""
    assert causal or src_mask is not None
    S, B = src.shape

    # embedding gather + positional encoding (plain-JAX glue; sqrt(d_model) is
    # already folded into the embedding table)
    x = jnp.take(params["emb"], src, axis=0)              # [S, B, D]
    x = x + params["pe"][:S][:, None, :]
    x_bsd = jnp.transpose(x, (1, 0, 2))                    # kernel layout [B, S, D]

    for layer in params["layers"]:
        x_bsd = encoder_layer(x_bsd, src_mask, layer,
                              nhead=params["nhead"], causal=causal)

    out_bsd = decoder(x_bsd, params["dec_w"], params["dec_b"])   # [B, S, V]
    return jnp.transpose(out_bsd, (1, 0, 2))                     # [S, B, V]

    # TODO(synk): dropout layers are stochastic in train mode; implemented here
    # as identity (eval semantics).


# ---------------------------------------------------------------------------
if __name__ == "__main__":
    NTOKENS, D_MODEL, NHEAD, D_HID, NLAYERS = 50, 32, 4, 64, 2
    SEQ, BATCH = 8, 2

    key = jax.random.PRNGKey(0)
    pkey, skey = jax.random.split(key)
    params = make_params(pkey, NTOKENS, D_MODEL, NHEAD, D_HID, NLAYERS)

    src = jax.random.randint(skey, (SEQ, BATCH), 0, NTOKENS, dtype=jnp.int32)
    # causal additive mask (like nn.Transformer.generate_square_subsequent_mask)
    tril = jnp.tril(jnp.ones((SEQ, SEQ), dtype=bool))
    src_mask = jnp.where(tril, 0.0, NEG_INF).astype(jnp.float32)

    # general path: explicit additive mask, DMA'd as [TQ, S] tiles
    out = transformer_forward(params, src, src_mask)
    out = jax.block_until_ready(out)
    assert out.shape == (SEQ, BATCH, NTOKENS), out.shape
    assert bool(jnp.all(jnp.isfinite(out)))

    # optimized path: causal mask generated in-kernel (no [S,S] DMA) -- must match
    out_c = transformer_forward(params, src, src_mask=None, causal=True)
    out_c = jax.block_until_ready(out_c)
    assert bool(jnp.allclose(out, out_c, atol=1e-4, rtol=1e-4))

    print("KERNEL_OK")
</pallas_src>

<mosaic_0001>
module attributes {stable_mosaic.version = 11 : i64} {
  func.func @_qkv_kernel(%arg0: i32, %arg1: i32, %arg2: memref<1x8x32xf32, #tpu.memory_space<vmem>>, %arg3: memref<32x96xbf16, #tpu.memory_space<vmem>>, %arg4: memref<1x96xf32, #tpu.memory_space<vmem>>, %arg5: memref<1x8x96xbf16, #tpu.memory_space<vmem>>) attributes {dimension_semantics = [#tpu.dimension_semantics<parallel>, #tpu.dimension_semantics<parallel>], iteration_bounds = array<i64: 2, 1>, scalar_prefetch = 0 : i64, scratch_operands = 0 : i64, tpu.core_type = #tpu.core_type<tc>, window_params = [{transform_indices = @transform_0, window_bounds = array<i64: 1, 8, 32>}, {pipeline_mode = #tpu.pipeline_mode<synchronous>, transform_indices = @transform_1, window_bounds = array<i64: 32, 96>}, {pipeline_mode = #tpu.pipeline_mode<synchronous>, transform_indices = @transform_2, window_bounds = array<i64: 1, 96>}, {transform_indices = @transform_3, window_bounds = array<i64: 1, 8, 96>}]} {
    %c0 = arith.constant 0 : index
    %c0_0 = arith.constant 0 : index
    %c0_1 = arith.constant 0 : index
    %0 = vector.load %arg2[%c0, %c0_0, %c0_1] : memref<1x8x32xf32, #tpu.memory_space<vmem>>, vector<1x8x32xf32>
    %1 = vector.shape_cast %0 : vector<1x8x32xf32> to vector<8x32xf32>
    %2 = arith.truncf %1 : vector<8x32xf32> to vector<8x32xbf16>
    %c0_2 = arith.constant 0 : index
    %c0_3 = arith.constant 0 : index
    %3 = vector.load %arg3[%c0_2, %c0_3] : memref<32x96xbf16, #tpu.memory_space<vmem>>, vector<32x96xbf16>
    %cst = arith.constant dense<0.000000e+00> : vector<8x96xf32>
    %4 = tpu.matmul %2, %3, %cst {dimension_numbers = #tpu.dot_dimension_numbers<[1], [0], [0], [1], [0, 0, 1, 1], [], []>} : vector<8x32xbf16>, vector<32x96xbf16>, vector<8x96xf32> -> vector<8x96xf32>
    %c0_4 = arith.constant 0 : index
    %c0_5 = arith.constant 0 : index
    %5 = vector.load %arg4[%c0_4, %c0_5] : memref<1x96xf32, #tpu.memory_space<vmem>>, vector<1x96xf32>
    %6 = vector.broadcast %5 : vector<1x96xf32> to vector<8x96xf32>
    %7 = arith.addf %4, %6 : vector<8x96xf32>
    %8 = arith.truncf %7 : vector<8x96xf32> to vector<8x96xbf16>
    %c0_6 = arith.constant 0 : index
    %c0_7 = arith.constant 0 : index
    %c0_8 = arith.constant 0 : index
    %9 = vector.load %arg5[%c0_6, %c0_7, %c0_8] : memref<1x8x96xbf16, #tpu.memory_space<vmem>>, vector<1x8x96xbf16>
    %10 = vector.shape_cast %9 : vector<1x8x96xbf16> to vector<8x96xbf16>
    %11 = vector.shape_cast %8 : vector<8x96xbf16> to vector<1x8x96xbf16>
    tpu.vector_store %arg5[%c0_6, %c0_7, %c0_8], %11 {strides = array<i32>} : memref<1x8x96xbf16, #tpu.memory_space<vmem>>, vector<1x8x96xbf16>,
    return
  }
  func.func @transform_0(%arg0: i32, %arg1: i32) -> (i32, i32, i32) {
    %c0_i32 = arith.constant 0 : i32
    %c0_i32_0 = arith.constant 0 : i32
    return %arg0, %arg1, %c0_i32 : i32, i32, i32
  }
  func.func @transform_1(%arg0: i32, %arg1: i32) -> (i32, i32) {
    %c0_i32 = arith.constant 0 : i32
    %c0_i32_0 = arith.constant 0 : i32
    %c0_i32_1 = arith.constant 0 : i32
    return %c0_i32, %c0_i32_0 : i32, i32
  }
  func.func @transform_2(%arg0: i32, %arg1: i32) -> (i32, i32) {
    %c0_i32 = arith.constant 0 : i32
    %c0_i32_0 = arith.constant 0 : i32
    %c0_i32_1 = arith.constant 0 : i32
    return %c0_i32, %c0_i32_0 : i32, i32
  }
  func.func @transform_3(%arg0: i32, %arg1: i32) -> (i32, i32, i32) {
    %c0_i32 = arith.constant 0 : i32
    %c0_i32_0 = arith.constant 0 : i32
    return %arg0, %arg1, %c0_i32 : i32, i32, i32
  }
}

</mosaic_0001>

<bundles_post_ra>
// kernel: tpu_custom_call.1
= control target key start
LH: loop header
LB: loop body
LE: loop exit
PB: predicated region body
PF: predicated region fallthrough
CT: control target
= control target key end

     0   :  { %8 = vsyncpa [#allocation3], 0  ;;  %s896_s0 = inlined_call_operand.hbm [shape: f32[2,8,32], index: 0, kind: input, shape index: {}]   ;;  %s897_s1 = inlined_call_operand.hbm [shape: bf16[32,96], index: 1, kind: input, shape index: {}]   ;;  %s898_s2 = inlined_call_operand.vmem [shape: f32[1,96], index: 2, kind: input, shape index: {}]   ;;  %s899_s3 = inlined_call_operand.hbm [shape: bf16[2,8,96], index: 3, kind: output, shape index: {}]  }
   0x1   :  { %10 = vsyncpa [#allocation3 + $0x1], 0 }
   0x2   :  { %11 = vsyncpa [#allocation6], 0 }
   0x3   :  { %12 = vsyncpa [#allocation4], 0 }
   0x4   :  { %14 = vsyncpa [#allocation4 + $0x1], 0  ;;  %s678_s12 = smov 0   ;;  %s680_s13 = smov 0  }
   0x5   :  { %s682_s14 = smov 0   ;;  %s684_s15 = smov 0  }
   0x6   :  { %s686_s16 = smov 0   ;;  %s688_s17 = smov 0  }
   0x7 LB: > { %s396_s18 = sadd.s32 4294967295, %s649_s17   ;;  %s397_s19 = sadd.s32 4294967294, %s649_s17   ;;  %s649_s17 = sphi %s688_s17, %s20_s17   ;;  %s645_s16 = sphi %s686_s16, %s923_s16   ;;  %s641_s15 = sphi %s684_s15, %s922_s15   ;;  %s637_s14 = sphi %s682_s14, %s921_s14   ;;  %s633_s13 = sphi %s680_s13, %s920_s13   ;;  %s629_s12 = sphi %s678_s12, %s919_s12  }
   0x8   : > { %p54_p0 = scmp.ne.s32.totalorder %s633_s13, %s629_s12  ;;  %p712_p1 = scmp.eq.s32.totalorder %s396_s18, 0 }
   0x9   : > { %p716_p2 = scmp.eq.s32.totalorder %s396_s18, 1  ;;  %p128_p3 = scmp.eq.s32.totalorder %s397_s19, 1 }
   0xa   : > { %s904_s20 = scalar_select %p712_p1, 1, 0 }
   0xb   : > { %s905_s21 = scalar_select %p716_p2, 1, 0 }
   0xc   : > { %p722_p4 = por %p712_p1, %p54_p0  ;;  %p398_p5 = scmp.ge.s32.totalorder %s649_s17, 1 }
   0xd   : > { %p727_p6 = por %p128_p3, %p54_p0  ;;  %p135_p7 = scmp.lt.s32.totalorder %s649_s17, 3 }
   0xe   : > { %s906_s22 = scalar_select %p722_p4, 1, 0 }
   0xf   : > { %s907_s23 = scalar_select %p727_p6, 1, 0 }
  0x10   : > { %p732_p8 = pnand %p398_p5, %p135_p7  ;;  %s651_s25 = smov [#allocation5]  }
  0x11   : > { %s147_s26 = sshll.u32 %s651_s25, 4  ;;  %s32_s28 = sadd.s32 1, %s645_s16  ;;  %s148_s26 = int_to_ptr.vmem [resolvable:$true] %s147_s26 }
  0x12   : > { %s908_s24 = scalar_select %p732_p8, 1, 0 }
  0x13   : > { %p434_p9 = pneg %p732_p8  ;;  %s505_s4 = scalar_lea.hbm %s897_s1, 256 }
  0x14   : > { %p506_p12 = scmp.ne.s32.totalorder %s897_s1, %s505_s4  ;;  %p512_p5 = scmp.lt.u32.totalorder %s505_s4, %s897_s1 }
  0x15   : > { %p741_p11 = pnand %p434_p9, %p712_p1 }
  0x17   : > { %p507_p13 = pneg %p741_p11 }
  0x19   : > { %p508_p0 = pnand %p507_p13, %p506_p12 }
  0x1b   : > { %p509_p3 = pneg %p508_p0 }
  0x1d   : > { %p514_p7 = pnand %p512_p5, %p509_p3 }
  0x1f   : > { %517 = shalt.err (!%p514_p7)
}
  0x20   : > { %s518_s9 = scalar_lea.vmem %s148_s26, 256  ;;  %p526_p1 = scmp.lt.s32.totalorder %s148_s26, %s148_s26 }
  0x21   : > { %p519_p9 = scmp.ne.s32.totalorder %s148_s26, %s518_s9  ;;  %p527_p4 = scmp.lt.s32.totalorder %s518_s9, %s518_s9 }
  0x23   : > { %p521_p10 = pnand %p519_p9, %p507_p13  ;;  %p528_p8 = por %p527_p4, %p526_p1 }
  0x25   : > { %p522_p6 = pneg %p521_p10 }
  0x27   : > { %p529_p2 = pnand %p528_p8, %p522_p6 }
  0x29   : > { %532 = shalt.err (!%p529_p2)
}
  0x2a   : > { %s652_s10 = smov 64   ;;  %s653_s11 = smov 4  }
  0x2b   : > { %437 = dma.hbm_to_vmem [thread:$0]  (!%p741_p11), %s897_s1, 256, %s148_s26, [#allocation6], %s652_s10, %s652_s10, %s653_s11  }
  0x2c   : > { %p34_p1 = scmp.ge.s32.totalorder %s32_s28, 2  ;;  %s41_s25 = sadd.s32 1, %s637_s14 }
  0x2d   : > { %p48_p2 = scmp.ne.s32.totalorder %s637_s14, %s633_s13  ;;  %p49_p4 = scmp.eq.s32.totalorder %s649_s17, 0 }
  0x2e   : > { %s925_s28 = smov (%p34_p1, %s32_s28), 0  ;;  %p911_p8 = scmp.ne.s32.totalorder %s905_s21, 0 }
  0x2f   : > { %p768_p6 = por %p49_p4, %p48_p2  ;;  %s36_s27 = ssub.s32 %s645_s16, %s925_s28 }
  0x30   : > { %p774_p10 = por %p911_p8, %p48_p2  ;;  %p447_p12 = scmp.lt.s32.totalorder %s649_s17, 2 }
  0x31   : > { %p39_p11 = scmp.eq.s32.totalorder %s36_s27, 0  ;;  %s164_s26 = sand.u32 1, %s637_s14  }
  0x32   : > { %s401_s4 = sshll.u32 %s164_s26, 3  ;;  %s402_s6 = sshll.u32 %s645_s16, 7 }
  0x33   : > { %s783_s5 = scalar_select %p39_p11, %s637_s14, %s41_s25  }
  0x34   : > { %s789_s9 = scalar_lea.hbm %s896_s0, %s402_s6  ;;  %s168_s21 = scalar_lea.vmem [#allocation2], %s401_s4 }
  0x35   : > { %s176_s10 = sshll.u32 %s168_s21, 4  ;;  %p795_p13 = pnand %p447_p12, %p768_p6  ;;  %s791_s10 = int_to_ptr.vmem [resolvable:$true] %s176_s10 }
  0x36   : > { %s165_s18 = scalar_lea.sflag [#allocation3], %s164_s26  ;;  %s533_s19 = scalar_lea.hbm %s789_s9, 128 }
  0x37   : > { %p534_p0 = scmp.ne.s32.totalorder %s789_s9, %s533_s19  ;;  %p535_p3 = pneg %p795_p13 }
  0x38   : > { %s538_s4 = scalar_lea.hbm %s896_s0, 256  ;;  %p539_p9 = scmp.lt.u32.totalorder %s789_s9, %s896_s0 }
  0x39   : > { %p536_p5 = pnand %p535_p3, %p534_p0  ;;  %p540_p1 = scmp.lt.u32.totalorder %s538_s4, %s533_s19 }
  0x3a   : > { %p542_p4 = scmp.lt.u32.totalorder %s533_s19, %s789_s9 }
  0x3b   : > { %p537_p7 = pneg %p536_p5  ;;  %p541_p2 = por %p540_p1, %p539_p9 }
  0x3d   : > { %p543_p6 = por %p542_p4, %p541_p2 }
  0x3f   : > { %p544_p8 = pnand %p543_p6, %p537_p7 }
  0x41   : > { %547 = shalt.err (!%p544_p8)
}
  0x42   : > { %s548_s26 = scalar_lea.vmem %s791_s10, 128  ;;  %s654_s7 = smov [#allocation2]  }
  0x43   : > { %p549_p12 = scmp.ne.s32.totalorder %s791_s10, %s548_s26  ;;  %s553_s8 = sshll.u32 %s654_s7, 4  ;;  %s554_s8 = int_to_ptr.vmem [resolvable:$false] %s553_s8 }
  0x44   : > { %s555_s21 = scalar_lea.vmem %s554_s8, 256  ;;  %p556_p5 = scmp.lt.s32.totalorder %s791_s10, %s554_s8 }
  0x45   : > { %p551_p11 = pnand %p549_p12, %p535_p3  ;;  %p557_p9 = scmp.lt.s32.totalorder %s555_s21, %s548_s26 }
  0x47   : > { %p552_p0 = pneg %p551_p11  ;;  %p558_p1 = por %p557_p9, %p556_p5 }
  0x49   : > { %p559_p2 = pnand %p558_p1, %p552_p0 }
  0x4b   : > { %562 = shalt.err (!%p559_p2)
}
  0x4c   : > { %441 = dma.hbm_to_vmem [thread:$0]  (!%p795_p13), %s789_s9, 128, %s791_s10, %s165_s18  }
  0x4d   : > { %p914_p7 = scmp.ne.s32.totalorder %s908_s24, 0 }
  0x4e   : > { %s827_s19 = sand.u32 (!%p914_p7), 1, %s633_s13   ;;  %p915_p3 = scmp.ne.s32.totalorder (!%p914_p7), %s906_s22, 0 }
  0x4f   : > { %185 = sbr.rel (%p914_p7) target bundleno = 329 (0x149), region = 32  ;;  %s404_s25 = sshll.u32 (!%p914_p7), %s827_s19, 3 }
  0x50   : > { %s188_s27 = scalar_lea.sflag (!%p914_p7), [#allocation3], %s827_s19  ;;  %s191_s4 = scalar_lea.vmem (!%p914_p7), [#allocation2], %s404_s25 }
  0x56   : > { %616 = dma.done.wait (%p915_p3), %s188_s27, 128  }
  0x57   : > { %618 = vsyncadd (%p915_p3), %s188_s27, 4294967168  ;;  %p916_p4 = scmp.ne.s32.totalorder %s904_s20, 0 }
  0x59   : > { %620 = dma.done.wait (%p916_p4), [#allocation6], 256  }
  0x5a   : > { %622 = vsyncadd (%p916_p4), [#allocation6], 4294967040  ;;  %v655_v0 = vmov 0.0   ;;  %vm656_vm0 = vmmov 0   ;;  %v503_v1 = vld [vmem:[#allocation5] sm:$0xff]   ;;  %v504_v2 = vld [vmem:[#allocation5 + $0x8] sm:$0xff]  }
  0x5b   : > { %418 = vmatprep.subr.bf16.mxu0 %v655_v0  ;;  %422 = vmatprep.mubr.msk.bf16.mxu0 %vm656_vm0, %v655_v0  ;;  %v219_v3 = vld [vmem:[%s191_s4] sm:$0xff]  ;;  %vm244_vm1 = vcmask 261120   ;;  %s406_s22 = sshll.u32 %s827_s19, 2  ;;  %s412_s9 = sshll.u32 %s641_s15, 6  ;;  %vm289_vm2 = vcmask 781312  }
  0x5c   : > { %419 = vmatpush3.bf16.msra.mxu0 %v503_v1  ;;  %v220_v4 = vpack.c.bf16 %v219_v3, %v219_v3  ;;  %v407_v5 = vld [vmem:[%s898_s2] ss:$0 sm:$0xff]  ;;  %s217_s10 = scalar_lea.vmem [#allocation7], %s406_s22  ;;  %s847_s6 = scalar_lea.hbm %s899_s3, %s412_s9 }
  0x5d   : > { %420 = vmatprep.subr.bf16.mxu0 %v655_v0  ;;  %s306_s11 = sshll.u32 %s217_s10, 4  ;;  %s292_s15 = scalar_lea.sflag [#allocation4], %s827_s19  ;;  %s849_s11 = int_to_ptr.vmem [resolvable:$true] %s306_s11 }
  0x5e   : > { %s563_s26 = scalar_lea.vmem %s849_s11, 64  ;;  %s657_s7 = smov [#allocation7]  }
  0x5f   : > { %p564_p13 = scmp.ne.s32.totalorder %s849_s11, %s563_s26  ;;  %s567_s8 = sshll.u32 %s657_s7, 4  ;;  %s568_s8 = int_to_ptr.vmem [resolvable:$false] %s567_s8 }
  0x60   : > { %421 = vmatpush3.bf16.msra.mxu0 %v504_v2  ;;  %s569_s21 = scalar_lea.vmem %s568_s8, 128  ;;  %p570_p12 = scmp.lt.s32.totalorder %s849_s11, %s568_s8 }
  0x61   : > { %p565_p6 = pnand %p564_p13, %p774_p10  ;;  %p571_p11 = scmp.lt.s32.totalorder %s569_s21, %s563_s26 }
  0x63   : > { %423 = vmatmul.mubr.msk.bf16.vlgmr.msra.gmra.mrb[0].mxu0 %vm244_vm1, %v220_v4  ;;  %p566_p8 = pneg %p565_p6  ;;  %p572_p0 = por %p571_p11, %p570_p12 }
  0x65   : > { %p573_p5 = pnand %p572_p0, %p566_p8 }
 0x136   : > { %v282_v6 = vpop.f32.mrb[0].mxu0 }
 0x137   : > { %v283_v7 = vadd.f32 %v407_v5, %v282_v6  ;;  %v424_v8 = vpop.f32.mrb[1].mxu0 }
 0x138   : > { %v285_v9 = vpop.f32.mrb[2].mxu0 }
 0x139   : > { %v288_v10 = vpack.c.bf16 %v283_v7, %v283_v7  ;;  %v425_v11 = vpop.f32.mrb[3].mxu0 }
 0x13b   : > { %290 = vst.msk [vmem:[%s217_s10] sm:$0xf] %vm289_vm2, %v288_v10 }
 0x13c   : > { %576 = shalt.err (!%p573_p5)
}
 0x13d   : > { %s577_s19 = scalar_lea.hbm %s847_s6, 64  ;;  %s581_s4 = scalar_lea.hbm %s899_s3, 128 }
 0x13e   : > { %p578_p9 = scmp.ne.s32.totalorder %s847_s6, %s577_s19  ;;  %p582_p7 = scmp.lt.u32.totalorder %s847_s6, %s899_s3 }
 0x13f   : > { %p583_p3 = scmp.lt.u32.totalorder %s581_s4, %s577_s19  ;;  %p585_p13 = scmp.lt.u32.totalorder %s577_s19, %s847_s6 }
 0x140   : > { %p579_p1 = pnand %p578_p9, %p774_p10 }
 0x141   : > { %p584_p4 = por %p583_p3, %p582_p7 }
 0x142   : > { %p580_p2 = pneg %p579_p1 }
 0x143   : > { %p586_p6 = por %p585_p13, %p584_p4 }
 0x145   : > { %p587_p8 = pnand %p586_p6, %p580_p2 }
 0x147   : > { %590 = shalt.err (!%p587_p8)
}
 0x148   : > { %432 = dma.vmem_to_hbm [thread:$0]  (%p774_p10), %s849_s11, 64, %s847_s6, %s292_s15  }
 0x149 PF: > { %s318_s20 = sand.u32 1, %s629_s12   ;;  %p917_p12 = scmp.ne.s32.totalorder %s907_s23, 0 }
 0x14a   : > { %p918_p11 = scmp.ge.s32.totalorder %s649_s17, 2  ;;  %s319_s9 = scalar_lea.sflag [#allocation4], %s318_s20 }
 0x14c   : > { %p443_p0 = pnand %p918_p11, %p917_p12 }
 0x14e   : > { %624 = dma.done.wait (!%p443_p0), %s319_s9, 64  }
 0x14f   : > { %626 = vsyncadd (!%p443_p0), %s319_s9, 4294967232  ;;  %s20_s17 = sadd.s32 1, %s649_s17   ;;  %s919_s12 = smov %s633_s13 }
 0x150   : > { %p17_p5 = scmp.ge.s32.totalorder %s20_s17, 4   ;;  %s920_s13 = smov %s637_s14 }
 0x151   : > { %s921_s14 = smov %s783_s5  ;;  %s922_s15 = smov %s645_s16 }
 0x152   : > { %s923_s16 = smov %s925_s28  ;;  %19 = sbr.rel (!%p17_p5) target bundleno = 7 (0x7), region = 81 }
 0x159   :  { %324 = vsyncpa [#allocation3], 1 }
 0x15a   :  { %326 = vsyncpa [#allocation3 + $0x1], 1 }
 0x15b   :  { %327 = vsyncpa [#allocation6], 1 }
 0x15c   :  { %328 = vsyncpa [#allocation4], 1 }
 0x15d   :  { %330 = vsyncpa [#allocation4 + $0x1], 1 }

</bundles_post_ra>
